<compile_context>
chip_gen: v5e
topology: v5e:2x2
jax: 0.10.0
libtpu: 0.0.40
codegen_flags: <defaults>
</compile_context>

<pallas_src>
import functools

import jax
import jax.numpy as jnp
from jax.experimental import pallas as pl
from jax.experimental.pallas import tpu as pltpu


def _eca_kernel(w_ref, x_ref, o_ref, *, kernel_size):
    """One block of BB images per grid step.

    w_ref : SMEM f32[K]          conv1d weights (flattened [1, 1, K])
    x_ref : VMEM  [BB, C, HW]    block of the input
    o_ref : VMEM  [BB, C, HW]    output block
    """
    bb, channels, hw = x_ref.shape

    # --- global average pool over the spatial (lane) axis, accumulated in f32.
    xf = x_ref[...].astype(jnp.float32)                         # (BB, C, HW)
    pooled = jnp.sum(xf, axis=-1, keepdims=True) * (1.0 / hw)   # (BB, C, 1)

    # --- K-tap conv over the channel (sublane) axis, zero padding, no bias.
    pad = (kernel_size - 1) // 2
    if pad > 0:
        zeros = jnp.zeros((bb, pad, 1), dtype=jnp.float32)
        padded = jnp.concatenate([zeros, pooled, zeros], axis=1)  # (BB, C+2p, 1)
    else:
        padded = pooled
    att = jnp.zeros_like(pooled)
    for k in range(kernel_size):                                # K is tiny & static
        att = att + w_ref[k] * padded[:, k:k + channels, :]
    att = jax.nn.sigmoid(att)                                   # (BB, C, 1), f32

    # --- rescale: re-read x from VMEM (vld is cheap) rather than keeping the
    #     first load live across the pool/conv; multiply in f32, store in I/O dtype.
    o_ref[...] = (x_ref[...].astype(jnp.float32) * att).astype(o_ref.dtype)


def _pick_block_batch(batch, per_batch_bytes, target_bytes):
    """Largest divisor of `batch` whose tile fits the per-step byte target,
    preferring >=2 grid steps (keeps both v7x TensorCores busy)."""
    cap = max(1, target_bytes // max(per_batch_bytes, 1))
    divisors = [d for d in range(1, batch + 1) if batch % d == 0]
    fits = [d for d in divisors if d <= cap] or [1]
    multi = [d for d in fits if batch // d >= 2]
    return max(multi) if multi else max(fits)


def eca_forward(x, conv_weight, *, target_block_bytes=8 << 20,
                vmem_limit_bytes=48 << 20):
    """x: [B, C, H, W] (NCHW, f32 or bf16). conv_weight: [K] or [1, 1, K]."""
    B, C, H, W = x.shape
    HW = H * W
    w = jnp.asarray(conv_weight, jnp.float32).reshape(-1)
    K = w.shape[0]

    # HW a multiple of 128 keeps the output stores unmasked / lane-dense.
    x2 = x.reshape(B, C, HW)

    per_batch_bytes = C * HW * jnp.dtype(x.dtype).itemsize
    BB = _pick_block_batch(B, per_batch_bytes, target_block_bytes)
    # TODO(synk): if a single image's (C, HW) footprint alone blows the VMEM
    # budget (very large C*HW on v7x's 64 MiB), tile the channel axis with a
    # (K-1)//2-channel halo instead of whole-image blocks.

    kernel = functools.partial(_eca_kernel, kernel_size=K)

    out = pl.pallas_call(
        kernel,
        out_shape=jax.ShapeDtypeStruct((B, C, HW), x.dtype),
        grid=(B // BB,),
        in_specs=[
            pl.BlockSpec(memory_space=pltpu.SMEM),             # conv weights (whole array)
            pl.BlockSpec((BB, C, HW), lambda b: (b, 0, 0)),    # BB whole images per step
        ],
        out_specs=pl.BlockSpec((BB, C, HW), lambda b: (b, 0, 0)),
        compiler_params=pltpu.CompilerParams(
            dimension_semantics=("parallel",),
            vmem_limit_bytes=vmem_limit_bytes,
        ),
    )(w, x2)

    return out.reshape(B, C, H, W)


def eca_reference(x, conv_weight):
    """Plain-JAX reference matching the PyTorch forward (f32 compute)."""
    B, C, H, W = x.shape
    w = jnp.asarray(conv_weight, jnp.float32).reshape(-1)
    K = w.shape[0]
    pad = (K - 1) // 2
    pooled = jnp.mean(x.astype(jnp.float32), axis=(2, 3))       # (B, C)
    padded = jnp.pad(pooled, ((0, 0), (pad, pad)))               # (B, C + 2*pad)
    att = jnp.zeros_like(pooled)
    for k in range(K):
        att = att + w[k] * padded[:, k:k + C]
    att = jax.nn.sigmoid(att)                                    # (B, C)
    return x.astype(jnp.float32) * att[:, :, None, None]


if __name__ == "__main__":
    key = jax.random.PRNGKey(0)
    kx, kw = jax.random.split(key)

    B, C, H, W = 2, 8, 16, 16
    kernel_size = 3

    x = jax.random.normal(kx, (B, C, H, W), dtype=jnp.float32)

    # Deterministic Conv1d(1, 1, K, bias=False) weight init (kaiming-uniform style).
    bound = 1.0 / (kernel_size ** 0.5)
    conv_weight = jax.random.uniform(
        kw, (kernel_size,), dtype=jnp.float32, minval=-bound, maxval=bound)

    # --- f32 I/O path -------------------------------------------------------
    out = jax.block_until_ready(eca_forward(x, conv_weight))
    ref = eca_reference(x, conv_weight)
    assert out.shape == (B, C, H, W)
    assert jnp.allclose(out, ref, atol=1e-5, rtol=1e-5), "f32 mismatch vs reference"

    # --- bf16 I/O path (halves HBM traffic; compute stays f32 in-kernel) ----
    x_bf16 = x.astype(jnp.bfloat16)
    out_bf16 = jax.block_until_ready(eca_forward(x_bf16, conv_weight))
    ref_bf16 = eca_reference(x_bf16, conv_weight)
    assert out_bf16.dtype == jnp.bfloat16
    assert jnp.allclose(out_bf16.astype(jnp.float32), ref_bf16,
                        atol=5e-2, rtol=5e-2), "bf16 mismatch vs reference"

    print("KERNEL_OK")
</pallas_src>

<mosaic_0001>
module attributes {stable_mosaic.version = 11 : i64} {
  func.func @_eca_kernel(%arg0: i32, %arg1: memref<3xf32, #tpu.memory_space<smem>>, %arg2: memref<1x8x256xf32, #tpu.memory_space<vmem>>, %arg3: memref<1x8x256xf32, #tpu.memory_space<vmem>>) attributes {dimension_semantics = [#tpu.dimension_semantics<parallel>], iteration_bounds = array<i64: 2>, scalar_prefetch = 0 : i64, scratch_operands = 0 : i64, tpu.core_type = #tpu.core_type<tc>, window_params = [{transform_indices = @transform_0, window_bounds = array<i64: 3>}, {transform_indices = @transform_1, window_bounds = array<i64: 1, 8, 256>}, {transform_indices = @transform_2, window_bounds = array<i64: 1, 8, 256>}]} {
    %c0 = arith.constant 0 : index
    %c0_0 = arith.constant 0 : index
    %c0_1 = arith.constant 0 : index
    %0 = vector.load %arg2[%c0, %c0_0, %c0_1] : memref<1x8x256xf32, #tpu.memory_space<vmem>>, vector<1x8x256xf32>
    %cst = arith.constant dense<0.000000e+00> : vector<1x8xf32>
    %1 = vector.multi_reduction <add>, %0, %cst [2] : vector<1x8x256xf32> to vector<1x8xf32>
    %2 = vector.shape_cast %1 : vector<1x8xf32> to vector<1x8x1xf32>
    %cst_2 = arith.constant 3.906250e-03 : f32
    %3 = vector.broadcast %cst_2 : f32 to vector<1x8x1xf32>
    %4 = arith.mulf %2, %3 : vector<1x8x1xf32>
    %cst_3 = arith.constant 0.000000e+00 : f32
    %5 = vector.broadcast %cst_3 : f32 to vector<1x1x1xf32>
    %6 = tpu.concatenate %5, %4, %5 in 1 : vector<1x1x1xf32>, vector<1x8x1xf32>, vector<1x1x1xf32> -> vector<1x10x1xf32>
    %cst_4 = arith.constant 0.000000e+00 : f32
    %7 = vector.broadcast %cst_4 : f32 to vector<1x8x1xf32>
    %c0_5 = arith.constant 0 : index
    %8 = memref.load %arg1[%c0_5] : memref<3xf32, #tpu.memory_space<smem>>
    %9 = vector.extract_strided_slice %6 {offsets = [0, 0, 0], sizes = [1, 8, 1], strides = [1, 1, 1]} : vector<1x10x1xf32> to vector<1x8x1xf32>
    %10 = vector.broadcast %8 : f32 to vector<1x8x1xf32>
    %11 = arith.mulf %10, %9 : vector<1x8x1xf32>
    %12 = arith.addf %7, %11 : vector<1x8x1xf32>
    %c1 = arith.constant 1 : index
    %13 = memref.load %arg1[%c1] : memref<3xf32, #tpu.memory_space<smem>>
    %14 = vector.extract_strided_slice %6 {offsets = [0, 1, 0], sizes = [1, 8, 1], strides = [1, 1, 1]} : vector<1x10x1xf32> to vector<1x8x1xf32>
    %15 = vector.broadcast %13 : f32 to vector<1x8x1xf32>
    %16 = arith.mulf %15, %14 : vector<1x8x1xf32>
    %17 = arith.addf %12, %16 : vector<1x8x1xf32>
    %c2 = arith.constant 2 : index
    %18 = memref.load %arg1[%c2] : memref<3xf32, #tpu.memory_space<smem>>
    %19 = vector.extract_strided_slice %6 {offsets = [0, 2, 0], sizes = [1, 8, 1], strides = [1, 1, 1]} : vector<1x10x1xf32> to vector<1x8x1xf32>
    %20 = vector.broadcast %18 : f32 to vector<1x8x1xf32>
    %21 = arith.mulf %20, %19 : vector<1x8x1xf32>
    %22 = arith.addf %17, %21 : vector<1x8x1xf32>
    %23 = arith.negf %22 : vector<1x8x1xf32>
    %24 = math.exp %23 : vector<1x8x1xf32>
    %cst_6 = arith.constant 1.000000e+00 : f32
    %25 = vector.broadcast %cst_6 : f32 to vector<1x8x1xf32>
    %26 = arith.addf %25, %24 : vector<1x8x1xf32>
    %27 = arith.divf %25, %26 : vector<1x8x1xf32>
    %c0_7 = arith.constant 0 : index
    %c0_8 = arith.constant 0 : index
    %c0_9 = arith.constant 0 : index
    %28 = vector.load %arg2[%c0_7, %c0_8, %c0_9] : memref<1x8x256xf32, #tpu.memory_space<vmem>>, vector<1x8x256xf32>
    %29 = vector.broadcast %27 : vector<1x8x1xf32> to vector<1x8x256xf32>
    %30 = arith.mulf %28, %29 : vector<1x8x256xf32>
    %c0_10 = arith.constant 0 : index
    %c0_11 = arith.constant 0 : index
    %c0_12 = arith.constant 0 : index
    %31 = vector.load %arg3[%c0_10, %c0_11, %c0_12] : memref<1x8x256xf32, #tpu.memory_space<vmem>>, vector<1x8x256xf32>
    tpu.vector_store %arg3[%c0_10, %c0_11, %c0_12], %30 {strides = array<i32>} : memref<1x8x256xf32, #tpu.memory_space<vmem>>, vector<1x8x256xf32>,
    return
  }
  func.func @transform_0(%arg0: i32) -> i32 {
    %c0_i32 = arith.constant 0 : i32
    %c0_i32_0 = arith.constant 0 : i32
    return %c0_i32 : i32
  }
  func.func @transform_1(%arg0: i32) -> (i32, i32, i32) {
    %c0_i32 = arith.constant 0 : i32
    %c0_i32_0 = arith.constant 0 : i32
    %c0_i32_1 = arith.constant 0 : i32
    return %arg0, %c0_i32, %c0_i32_0 : i32, i32, i32
  }
  func.func @transform_2(%arg0: i32) -> (i32, i32, i32) {
    %c0_i32 = arith.constant 0 : i32
    %c0_i32_0 = arith.constant 0 : i32
    %c0_i32_1 = arith.constant 0 : i32
    return %arg0, %c0_i32, %c0_i32_0 : i32, i32, i32
  }
}

</mosaic_0001>

<bundles_post_ra>
// kernel: tpu_custom_call.1
= control target key start
LH: loop header
LB: loop body
LE: loop exit
PB: predicated region body
PF: predicated region fallthrough
CT: control target
= control target key end

     0   :  { %7 = vsyncpa [#allocation5], 0  ;;  %s703_s0 = inlined_call_operand.hbm [shape: f32[3], index: 0, kind: input, shape index: {}]   ;;  %s704_s1 = inlined_call_operand.hbm [shape: f32[2,8,256], index: 1, kind: input, shape index: {}]   ;;  %s705_s2 = inlined_call_operand.hbm [shape: f32[2,8,256], index: 2, kind: output, shape index: {}]  }
   0x1   :  { %8 = vsyncpa [#allocation3], 0 }
   0x2   :  { %10 = vsyncpa [#allocation3 + $0x1], 0 }
   0x3   :  { %11 = vsyncpa [#allocation4], 0 }
   0x4   :  { %13 = vsyncpa [#allocation4 + $0x1], 0  ;;  %s561_s9 = smov 0   ;;  %s563_s10 = smov 0  }
   0x5   :  { %s565_s11 = smov 0   ;;  %s567_s12 = smov 0  }
   0x6 LB: > { %s582_s13 = sadd.s32 4294967295, %s542_s12   ;;  %s343_s14 = sadd.s32 4294967294, %s542_s12   ;;  %s542_s12 = sphi %s567_s12, %s715_s12   ;;  %s538_s11 = sphi %s565_s11, %s714_s11   ;;  %s534_s10 = sphi %s563_s10, %s713_s10   ;;  %s530_s9 = sphi %s561_s9, %s712_s9  }
   0x7   : > { %p60_p0 = scmp.ne.s32.totalorder %s534_s10, %s530_s9  ;;  %p61_p1 = scmp.eq.s32.totalorder %s582_s13, 0 }
   0x8   : > { %p84_p2 = scmp.eq.s32.totalorder %s582_s13, 1  ;;  %p90_p3 = scmp.eq.s32.totalorder %s343_s14, 1 }
   0x9   : > { %p591_p4 = por %p61_p1, %p60_p0  ;;  %p344_p5 = scmp.ge.s32.totalorder %s542_s12, 1 }
   0xa   : > { %p596_p6 = por %p90_p3, %p60_p0  ;;  %p97_p7 = scmp.lt.s32.totalorder %s542_s12, 3 }
   0xb   : > { %s109_s19 = sshll.u32 %s703_s0, 4  ;;  %s612_s21 = sadd.s32 1, %s542_s12   ;;  %s110_s19 = int_to_ptr.hbm [resolvable:$true] %s109_s19 }
   0xc   : > { %p604_p8 = pnand %p344_p5, %p97_p7  ;;  %s44_s22 = ssub.s32 %s542_s12, %s612_s21 }
   0xd   : > { %p45_p12 = scmp.eq.s32.totalorder %s44_s22, 0  ;;  %s47_s23 = sadd.s32 1, %s538_s11 }
   0xe   : > { %p372_p10 = pneg %p604_p8  ;;  %p54_p13 = scmp.ne.s32.totalorder %s538_s11, %s534_s10 }
   0xf   : > { %s544_s24 = smov [#allocation2]   ;;  %p55_p0 = scmp.eq.s32.totalorder %s542_s12, 0 }
  0x10   : > { %p373_p11 = pnand %p372_p10, %p61_p1  ;;  %p627_p3 = por %p84_p2, %p54_p13 }
  0x11   : > { %s622_s25 = scalar_select %p45_p12, %s538_s11, %s47_s23  }
  0x12   : > { %375 = dma.hbm_to_smem (!%p373_p11), %s110_s19, 16, %s544_s24, [#allocation5]  }
  0x13   : > { %s120_s27 = sand.u32 1, %s538_s11   ;;  %p56_p5 = por %p55_p0, %p54_p13 }
  0x14   : > { %p385_p7 = scmp.lt.s32.totalorder %s542_s12, 2  ;;  %s347_s28 = sshll.u32 %s120_s27, 4 }
  0x15   : > { %s362_s29 = sshll.u32 %s542_s12, 4  ;;  %s124_s6 = scalar_lea.vmem [#allocation6], %s347_s28 }
  0x16   : > { %s129_s4 = scalar_lea.hbm %s704_s1, %s362_s29  ;;  %s133_s7 = sshll.u32 %s124_s6, 4  ;;  %s134_s7 = int_to_ptr.vmem [resolvable:$true] %s133_s7 }
  0x17   : > { %s131_s5 = sshll.u32 %s129_s4, 4  ;;  %p637_p10 = pnand %p385_p7, %p56_p5  ;;  %s132_s5 = int_to_ptr.hbm [resolvable:$true] %s131_s5 }
  0x18   : > { %s121_s14 = scalar_lea.sflag [#allocation3], %s120_s27  ;;  %s442_s17 = sshra.s32 %s132_s5, 4  ;;  %s443_s17 = int_to_ptr.hbm [resolvable:$true] %s442_s17 }
  0x19   : > { %s444_s18 = scalar_lea.hbm %s443_s17, 16  ;;  %p446_p11 = pneg %p637_p10 }
  0x1a   : > { %p445_p2 = scmp.ne.s32.totalorder %s443_s17, %s444_s18  ;;  %s449_s23 = scalar_lea.hbm %s704_s1, 32 }
  0x1b   : > { %p450_p0 = scmp.lt.s32.totalorder %s443_s17, %s704_s1  ;;  %p451_p5 = scmp.lt.s32.totalorder %s449_s23, %s444_s18 }
  0x1c   : > { %p447_p12 = pnand %p446_p11, %p445_p2 }
  0x1d   : > { %p452_p7 = por %p451_p5, %p450_p0 }
  0x1e   : > { %p448_p13 = pneg %p447_p12 }
  0x20   : > { %p453_p9 = pnand %p452_p7, %p448_p13 }
  0x22   : > { %456 = shalt.err (!%p453_p9)
}
  0x23   : > { %379 = dma.hbm_to_vmem [thread:$0]  (!%p637_p10), %s132_s5, 256, %s134_s7, %s121_s14  }
  0x24   : > { %142 = sbr.rel (%p604_p8) target bundleno = 330 (0x14a), region = 28 }
  0x29   : > { %517 = dma.done.wait (%p61_p1), [#allocation5], 16  }
  0x2a   : > { %519 = vsyncadd (%p61_p1), [#allocation5], 4294967280  ;;  %s658_s27 = sand.u32 1, %s534_s10  }
  0x2b   : > { %s352_s29 = sshll.u32 %s658_s27, 4  ;;  %s150_s30 = scalar_lea.sflag [#allocation3], %s658_s27 }
  0x2c   : > { %s153_s3 = scalar_lea.vmem [#allocation6], %s352_s29 }
  0x2d   : > { %521 = dma.done.wait (%p591_p4), %s150_s30, 256  }
  0x2e   : > { %523 = vsyncadd (%p591_p4), %s150_s30, 4294967040 }
  0x2f   : > { %159 = sfence }
  0x30   : > { %v176_v0 = vld [vmem:[%s153_s3] sm:$0xff]  ;;  %v177_v1 = vld [vmem:[%s153_s3 + $0x8] sm:$0xff]  ;;  %s354_s20 = sld [smem:[#allocation2 + $0x1]]  ;;  %v545_v3 = vmov 0   ;;  %vm185_vm0 = vcmask 1040384   ;;  %vm198_vm1 = vcmask 1046528  }
  0x31   : > { %v178_v2 = vadd.f32 %v177_v1, %v176_v0  ;;  %s355_s4 = sld [smem:[#allocation2 + $0x2]]  ;;  %422 = vset.pattern.permute.xlu0 %v545_v3  ;;  %vm210_vm2 = vcmask 1045504   ;;  %s363_s15 = sshll.u32 %s582_s13, 4 }
  0x32   : > { %s188_s5 = sld [smem:[#allocation2]]  ;;  %s256_s8 = scalar_lea.hbm %s705_s2, %s363_s15 }
  0x33   : > { %179 = vadd.xlane.f32.xlu0 %v178_v2  ;;  %s175_s14 = scalar_lea.vmem [#allocation7], %s352_s29  ;;  %s260_s18 = sshll.u32 %s256_s8, 4  ;;  %s261_s18 = int_to_ptr.hbm [resolvable:$true] %s260_s18 }
  0x34   : > { %s258_s17 = sshll.u32 %s175_s14, 4  ;;  %s245_s19 = scalar_lea.sflag [#allocation4], %s658_s27  ;;  %s259_s17 = int_to_ptr.vmem [resolvable:$true] %s258_s17 }
  0x35   : > { %s486_s22 = sshra.s32 %s261_s18, 4  ;;  %s492_s28 = scalar_lea.hbm %s705_s2, 32  ;;  %s487_s22 = int_to_ptr.hbm [resolvable:$true] %s486_s22 }
  0x36   : > { %v193_v6 = vstv %s354_s20  ;;  %s488_s13 = scalar_lea.hbm %s487_s22, 16  ;;  %p493_p9 = scmp.lt.s32.totalorder %s487_s22, %s705_s2 }
  0x37   : > { %v205_v7 = vstv %s355_s4  ;;  %p489_p1 = scmp.ne.s32.totalorder %s487_s22, %s488_s13  ;;  %p494_p10 = scmp.lt.s32.totalorder %s492_s28, %s488_s13 }
  0x38   : > { %v189_v11 = vstv %s188_s5 }
  0x39   : > { %p490_p4 = pnand %p489_p1, %p627_p3  ;;  %p495_p2 = por %p494_p10, %p493_p9 }
  0x3b   : > { %p491_p8 = pneg %p490_p4 }
  0x3d   : > { %p496_p11 = pnand %p495_p2, %p491_p8 }
  0xa6   : > { %v180_v4 = vpop.xlane.xlu0 %179 }
  0xa7   : > { %v181_v5 = vmul.f32 0.00390625, %v180_v4 }
  0xa9   : > { %v183_v8 = vrot.slane %v181_v5, 7 }
  0xab   : > { %v186_v9 = vsel %vm185_vm0, 0.0, %v183_v8  ;;  %v187_v10 = vsel %vm185_vm0, %v183_v8, 0.0 }
  0xac   : > { %v194_v12 = vmul.f32 %v193_v6, %v186_v9  ;;  %v195_v13 = vmul.f32 %v193_v6, %v187_v10  ;;  %v206_v14 = vmul.f32 %v205_v7, %v186_v9  ;;  %v207_v15 = vmul.f32 %v205_v7, %v187_v10 }
  0xad   : > { %v190_v19 = vmul.f32 %v189_v11, %v186_v9 }
  0xae   : > { %v199_v16 = vrot.slane %v194_v12, 1  ;;  %v200_v17 = vrot.slane %v195_v13, 1  ;;  %v211_v18 = vrot.slane %v206_v14, 2  ;;  %v212_v20 = vrot.slane %v207_v15, 2 }
  0xb0   : > { %v201_v21 = vsel %vm198_vm1, %v199_v16, %v200_v17  ;;  %v213_v23 = vsel %vm210_vm2, %v211_v18, %v212_v20 }
  0xb1   : > { %v203_v22 = vadd.f32 %v201_v21, %v190_v19 }
  0xb3   : > { %v215_v24 = vadd.f32 %v213_v23, %v203_v22 }
  0xb5   : > { %v356_v25 = vmul.f32 -1.442695, %v215_v24 }
  0xb7   : > { %423 = vpow2.f32 %v356_v25 }
  0xbd   : > { %v424_v26 = vpop.eup %423 }
  0xbe   : > { %v219_v27 = vadd.f32 1.0, %v424_v26 }
  0xc0   : > { %425 = vrcp.f32 %v219_v27  ;;  %v231_v31 = vand.u32 2147483648, %v219_v27  ;;  %v229_v33 = vand.u32 2147483647, %v219_v27  ;;  %vm225_vm4 = vweird.f32 %v219_v27 }
  0xc2   : > { %v232_v35 = vor.u32 1.1754944e-38, %v231_v31  ;;  %vm230_vm6 = vcmp.eq.f32.partialorder %v229_v33, 8.507059e+37 }
  0xc6   : > { %v426_v28 = vpop.eup %425 }
  0xc7   : > { %v221_v29 = vmul.f32 %v426_v28, %v219_v27  ;;  %vm226_vm3 = vweird.f32 %v426_v28 }
  0xc8   : > { %vm227_vm5 = vmor %vm225_vm4, %vm226_vm3 }
  0xc9   : > { %v222_v30 = vsub.f32 1.0, %v221_v29 }
  0xcb   : > { %v223_v32 = vmul.f32 %v426_v28, %v222_v30 }
  0xcd   : > { %v224_v34 = vadd.f32 %v426_v28, %v223_v32 }
  0xcf   : > { %v228_v36 = vsel %vm227_vm5, %v426_v28, %v224_v34 }
  0xd0   : > { %v233_v37 = vsel %vm230_vm6, %v232_v35, %v228_v36 }
  0xd1   : > { %237 = vperm.xlu0 %422, %v233_v37  }
 0x143   : > { %v238_v38 = vpop.permute.xlu0 %237 }
 0x144   : > { %v240_v39 = vmul.f32 %v238_v38, %v176_v0  ;;  %v241_v40 = vmul.f32 %v238_v38, %v177_v1 }
 0x146   : > { %242 = vst [vmem:[%s175_s14] sm:$0xff] %v240_v39 }
 0x147   : > { %243 = vst [vmem:[%s175_s14 + $0x8] sm:$0xff] %v241_v40 }
 0x148   : > { %499 = shalt.err (!%p496_p11)
}
 0x149   : > { %370 = dma.vmem_to_hbm [thread:$0]  (%p627_p3), %s259_s17, 256, %s261_s18, %s245_s19  }
 0x14a PF: > { %s272_s27 = sand.u32 1, %s530_s9   ;;  %p711_p12 = scmp.ge.s32.totalorder %s542_s12, 2 }
 0x14b   : > { %s273_s3 = scalar_lea.sflag [#allocation4], %s272_s27 }
 0x14c   : > { %p381_p13 = pnand %p711_p12, %p596_p6 }
 0x14e   : > { %p382_p0 = pneg %p381_p13 }
 0x150   : > { %525 = dma.done.wait (%p382_p0), %s273_s3, 256  }
 0x151   : > { %527 = vsyncadd (%p382_p0), %s273_s3, 4294967040  ;;  %p16_p5 = scmp.ge.s32.totalorder %s612_s21, 4   ;;  %s712_s9 = smov %s534_s10 }
 0x152   : > { %s713_s10 = smov %s538_s11  ;;  %s714_s11 = smov %s622_s25 }
 0x153   : > { %s715_s12 = smov %s612_s21  ;;  %18 = sbr.rel (!%p16_p5) target bundleno = 6 (0x6), region = 78 }
 0x158   :  { %279 = vsyncpa [#allocation3], 1 }
 0x159   :  { %281 = vsyncpa [#allocation3 + $0x1], 1 }
 0x15a   :  { %282 = vsyncpa [#allocation4], 1 }
 0x15b   :  { %284 = vsyncpa [#allocation4 + $0x1], 1 }
 0x15c   :  { %285 = vsyncpa [#allocation5], 1 }
 0x15d   :  { %287 = vsyncpa [#allocation5 + $0x1], 1 }

</bundles_post_ra>
